<compile_context>
chip_gen: v7x
topology: tpu7x:2x2x1
jax: 0.10.0
libtpu: 0.0.40
codegen_flags: <defaults>
</compile_context>

<pallas_src>
import math
import functools

import jax
import jax.numpy as jnp
from jax.experimental import pallas as pl
from jax.experimental.pallas import tpu as pltpu


_LANE = 128  # TPU lane width (minor VMEM dim pads to this)


def _gee_kernel(x_ref, w_ref, o_ref, *, link_func: str):
    # x_ref: [row_tile, D], w_ref: [1, D], o_ref: [row_tile, 1]
    x = x_ref[...].astype(jnp.float32)
    w = w_ref[...].astype(jnp.float32)
    # VPU elementwise multiply + XLU cross-lane reduce -> [row_tile, 1].
    # (Deliberately NOT an M=1 MXU contraction: the MXU path would bottleneck
    # below HBM rate on v6e/v7x; VPU+XLU keeps the kernel memory-bound.)
    z = jnp.sum(x * w, axis=1, keepdims=True)
    if link_func == "sigmoid":
        y = jax.nn.sigmoid(z)
    elif link_func == "probit":
        # Normal(0, 1).cdf(z) = 0.5 * (1 + erf(z / sqrt(2)))
        y = 0.5 * (1.0 + jax.lax.erf(z * (1.0 / math.sqrt(2.0))))
    else:
        raise NotImplementedError(link_func)
    o_ref[...] = y.astype(o_ref.dtype)


def _choose_row_tile(n: int, d: int, itemsize: int,
                     target_tile_bytes: int = 8 << 20) -> int:
    """Row tile sized on the *lane-padded* VMEM footprint (~8 MiB/buffer),
    capped so the grid gets >= 2 steps when the problem is big enough (v7x
    megacore), and collapsed to a single full block for tiny N."""
    padded_d = pl.cdiv(d, _LANE) * _LANE          # minor dim pads to 128 in VMEM
    bytes_per_row = padded_d * itemsize
    rows = max(_LANE, (target_tile_bytes // bytes_per_row) // _LANE * _LANE)
    if n >= 2 * _LANE:
        # Prefer at least 2 grid steps so the "parallel" row axis can split
        # across v7x's two TensorCores.
        half = pl.cdiv(pl.cdiv(n, 2), _LANE) * _LANE
        rows = min(rows, half)
    if rows >= n:
        rows = n  # single block equal to the full dim is always legal
    return int(rows)


def _vmem_limit_bytes(row_tile: int, d: int, in_itemsize: int,
                      out_itemsize: int) -> int:
    padded_d = pl.cdiv(d, _LANE) * _LANE
    padded_rows = pl.cdiv(row_tile, 32) * 32      # covers f32/bf16 sublane packing
    x_buf = padded_rows * padded_d * in_itemsize
    o_buf = padded_rows * _LANE * out_itemsize    # minor dim 1 pads to 128 lanes
    w_buf = 32 * padded_d * in_itemsize
    need = 2 * (x_buf + o_buf + w_buf) + (2 << 20)  # double-buffered + margin
    # Keep comfortably below v7x's 64 MiB physical VMEM; raise above the 16 MiB
    # scoped default so bigger tiles work on v5e/v6e too.
    return int(min(max(need, 16 << 20), 48 << 20))


def gee_forward(x: jax.Array, weight: jax.Array, link_func: str = "sigmoid",
                *, row_tile: int | None = None) -> jax.Array:
    """Pallas forward of GEEModel.

    x:      [N, D] (f32 or bf16 — stream whatever dtype x is stored in)
    weight: PyTorch nn.Linear weight, shape [1, D] (also accepts [D] / [D, 1]).
    Returns [N, 1] in x's dtype.
    """
    N, D = x.shape
    w = weight.reshape(1, D).astype(x.dtype)
    out_dtype = x.dtype

    in_itemsize = jnp.dtype(x.dtype).itemsize
    out_itemsize = jnp.dtype(out_dtype).itemsize

    if row_tile is None:
        row_tile = _choose_row_tile(N, D, in_itemsize)
    else:
        row_tile = int(row_tile)
        if row_tile >= N:
            row_tile = N
        else:
            row_tile = max(8, (row_tile // 8) * 8)

    grid_rows = pl.cdiv(N, row_tile)  # ragged last block handled by Pallas

    kernel = functools.partial(_gee_kernel, link_func=link_func)

    out = pl.pallas_call(
        kernel,
        out_shape=jax.ShapeDtypeStruct((N, 1), out_dtype),
        grid_spec=pltpu.PrefetchScalarGridSpec(
            num_scalar_prefetch=0,
            grid=(grid_rows,),
            in_specs=[
                # x tile streams through VMEM (auto double-buffered pipeline).
                pl.BlockSpec((row_tile, D), lambda i: (i, 0)),
                # Weight is tiny and stays resident (same block every step).
                pl.BlockSpec((1, D), lambda i: (0, 0)),
            ],
            # Narrow [row_tile, 1] output; its bytes are <= 1/D of the input
            # stream, so the masked stores hide under the input DMA.
            out_specs=pl.BlockSpec((row_tile, 1), lambda i: (i, 0)),
        ),
        compiler_params=pltpu.CompilerParams(
            # "parallel" shards the row axis across v7x's two TensorCores.
            dimension_semantics=("parallel",),
            vmem_limit_bytes=_vmem_limit_bytes(row_tile, D, in_itemsize,
                                               out_itemsize),
        ),
        cost_estimate=pl.CostEstimate(
            flops=2 * N * D,
            transcendentals=N,
            bytes_accessed=N * D * in_itemsize + N * out_itemsize
                           + D * in_itemsize,
        ),
    )(x, w)

    return out


def _reference(x, weight, link_func):
    w = weight.reshape(1, x.shape[1])
    z = jnp.dot(x.astype(jnp.float32), w.T.astype(jnp.float32),
                precision=jax.lax.Precision.HIGHEST)
    if link_func == "sigmoid":
        return jax.nn.sigmoid(z)
    return 0.5 * (1.0 + jax.lax.erf(z / math.sqrt(2.0)))


if __name__ == "__main__":
    key = jax.random.PRNGKey(0)
    kx, kw, kx2, kw2 = jax.random.split(key, 4)

    # --- small shapes consistent with the module: N samples, input_dim features ---
    N, D = 8, 32
    x = jax.random.normal(kx, (N, D), dtype=jnp.float32)
    bound = 1.0 / math.sqrt(D)  # torch.nn.Linear default init range
    w = jax.random.uniform(kw, (1, D), dtype=jnp.float32, minval=-bound, maxval=bound)

    y_sig = jax.block_until_ready(gee_forward(x, w, "sigmoid"))
    y_pro = jax.block_until_ready(gee_forward(x, w, "probit"))
    assert y_sig.shape == (N, 1) and y_pro.shape == (N, 1)
    assert jnp.allclose(y_sig, _reference(x, w, "sigmoid"), atol=1e-5, rtol=1e-5)
    assert jnp.allclose(y_pro, _reference(x, w, "probit"), atol=1e-5, rtol=1e-5)

    # --- multi-step pipelined grid with a ragged last block (no jnp.pad copy) ---
    N2, D2 = 1000, 64
    x2 = jax.random.normal(kx2, (N2, D2), dtype=jnp.float32)
    b2 = 1.0 / math.sqrt(D2)
    w2 = jax.random.uniform(kw2, (1, D2), dtype=jnp.float32, minval=-b2, maxval=b2)

    y2 = jax.block_until_ready(gee_forward(x2, w2, "sigmoid", row_tile=256))
    assert y2.shape == (N2, 1)
    assert jnp.allclose(y2, _reference(x2, w2, "sigmoid"), atol=1e-4, rtol=1e-4)

    # --- bf16-stored input (opt-in, cast happens UPSTREAM, not in the wrapper) ---
    N3, D3 = 512, 64
    x3 = jax.random.normal(kx2, (N3, D3), dtype=jnp.float32).astype(jnp.bfloat16)
    w3 = w2.astype(jnp.bfloat16)
    y3 = jax.block_until_ready(gee_forward(x3, w3, "sigmoid"))
    assert y3.shape == (N3, 1)
    ref3 = _reference(x3.astype(jnp.float32), w3.astype(jnp.float32), "sigmoid")
    assert jnp.allclose(y3.astype(jnp.float32), ref3, atol=2e-2, rtol=2e-2)

    print("KERNEL_OK")
</pallas_src>

<mosaic_0001>
module attributes {stable_mosaic.version = 11 : i64} {
  func.func @_gee_kernel(%arg0: i32, %arg1: memref<8x32xf32, #tpu.memory_space<vmem>>, %arg2: memref<1x32xf32, #tpu.memory_space<vmem>>, %arg3: memref<8x1xf32, #tpu.memory_space<vmem>>) attributes {dimension_semantics = [#tpu.dimension_semantics<parallel>], iteration_bounds = array<i64: 1>, scalar_prefetch = 0 : i64, scratch_operands = 0 : i64, tpu.core_type = #tpu.core_type<tc>, window_params = [{transform_indices = @transform_0, window_bounds = array<i64: 8, 32>}, {pipeline_mode = #tpu.pipeline_mode<synchronous>, transform_indices = @transform_1, window_bounds = array<i64: 1, 32>}, {transform_indices = @transform_2, window_bounds = array<i64: 8, 1>}]} {
    %c0 = arith.constant 0 : index
    %c0_0 = arith.constant 0 : index
    %0 = vector.load %arg1[%c0, %c0_0] : memref<8x32xf32, #tpu.memory_space<vmem>>, vector<8x32xf32>
    %c0_1 = arith.constant 0 : index
    %c0_2 = arith.constant 0 : index
    %1 = vector.load %arg2[%c0_1, %c0_2] : memref<1x32xf32, #tpu.memory_space<vmem>>, vector<1x32xf32>
    %2 = vector.broadcast %1 : vector<1x32xf32> to vector<8x32xf32>
    %3 = arith.mulf %0, %2 : vector<8x32xf32>
    %cst = arith.constant dense<0.000000e+00> : vector<8xf32>
    %4 = vector.multi_reduction <add>, %3, %cst [1] : vector<8x32xf32> to vector<8xf32>
    %5 = vector.shape_cast %4 : vector<8xf32> to vector<8x1xf32>
    %6 = arith.negf %5 : vector<8x1xf32>
    %7 = math.exp %6 : vector<8x1xf32>
    %cst_3 = arith.constant 1.000000e+00 : f32
    %8 = vector.broadcast %cst_3 : f32 to vector<8x1xf32>
    %9 = arith.addf %8, %7 : vector<8x1xf32>
    %10 = arith.divf %8, %9 : vector<8x1xf32>
    %c0_4 = arith.constant 0 : index
    %c0_5 = arith.constant 0 : index
    %11 = vector.load %arg3[%c0_4, %c0_5] : memref<8x1xf32, #tpu.memory_space<vmem>>, vector<8x1xf32>
    tpu.vector_store %arg3[%c0_4, %c0_5], %10 {strides = array<i32>} : memref<8x1xf32, #tpu.memory_space<vmem>>, vector<8x1xf32>,
    return
  }
  func.func @transform_0(%arg0: i32) -> (i32, i32) {
    %c0_i32 = arith.constant 0 : i32
    %c0_i32_0 = arith.constant 0 : i32
    return %arg0, %c0_i32 : i32, i32
  }
  func.func @transform_1(%arg0: i32) -> (i32, i32) {
    %c0_i32 = arith.constant 0 : i32
    %c0_i32_0 = arith.constant 0 : i32
    %c0_i32_1 = arith.constant 0 : i32
    return %c0_i32, %c0_i32_0 : i32, i32
  }
  func.func @transform_2(%arg0: i32) -> (i32, i32) {
    %c0_i32 = arith.constant 0 : i32
    %c0_i32_0 = arith.constant 0 : i32
    return %arg0, %c0_i32 : i32, i32
  }
}

</mosaic_0001>

<bundles_post_ra>
// kernel: tpu_custom_call.1
= control target key start
LH: loop header
LB: loop body
LE: loop exit
PB: predicated region body
PF: predicated region fallthrough
CT: control target
= control target key end

     0   :  { %7 = vsyncpa [#allocation3], 0  ;;  %s80_s9 = smov [#allocation2]   ;;  %s114_s0 = inlined_call_operand.hbm [shape: f32[8,32], index: 0, kind: input, shape index: {}]   ;;  %s115_s1 = inlined_call_operand.vmem [shape: f32[1,32], index: 1, kind: input, shape index: {}]   ;;  %s116_s2 = inlined_call_operand.vmem [shape: f32[8,1], index: 2, kind: output, shape index: {}]  }
   0x1   :  { %s14_s10 = sshll.u32 %s80_s9, 4  ;;  %s56_s13 = scalar_lea.hbm %s114_s0, 128  ;;  %s15_s10 = int_to_ptr.vmem [resolvable:$true] %s14_s10 }
   0x2   :  { %p57_p0 = scmp.ne.s32.totalorder %s114_s0, %s56_s13  ;;  %p60_p1 = scmp.lt.u32.totalorder %s56_s13, %s114_s0 }
   0x4   :  { %p62_p2 = pnand %p60_p1, %p57_p0 }
   0x6   :  { %65 = shalt.err (!%p62_p2)
}
   0x7   :  { %s66_s18 = scalar_lea.vmem %s15_s10, 128  ;;  %p71_p4 = scmp.lt.s32.totalorder %s15_s10, %s15_s10 }
   0x8   :  { %p67_p3 = scmp.ne.s32.totalorder %s15_s10, %s66_s18  ;;  %p72_p5 = scmp.lt.s32.totalorder %s66_s18, %s66_s18 }
   0xa   :  { %p73_p6 = por %p72_p5, %p71_p4 }
   0xc   :  { %p74_p7 = pnand %p73_p6, %p67_p3 }
   0xe   :  { %77 = shalt.err (!%p74_p7)
}
   0xf   :  { %17 = dma.hbm_to_vmem [thread:$0]  %s114_s0, 128, %s15_s10, [#allocation3]  }
  0x10   :  { %78 = dma.done.wait [#allocation3], 128  }
  0x11   :  { %79 = vsyncadd [#allocation3], 4294967168  ;;  %v23_v0 = vld [vmem:[#allocation2] sm:$0xff]  ;;  %vm32_vm0 = vcmask 261120   ;;  %vm42_vm1 = vcmask 7168  }
  0x12   :  { %v49_v1 = vld [vmem:[%s115_s1] ss:$0 sm:$0xff] }
  0x13   :  { %v31_v2 = vmul.f32 %v49_v1, %v23_v0 }
  0x15   :  { %v33_v3 = vsel %vm32_vm0, %v31_v2, 0.0 }
  0x16   :  { %34 = vadd.xlane.f32.xlu0 %v33_v3 }
  0xa3   :  { %v35_v4 = vpop.xlane.xlu0 %34 }
  0xa4   :  { %v50_v5 = vmul.f32 -1.442695, %v35_v4 }
  0xa6   :  { %52 = vpow2.f32 %v50_v5 }
  0xb0   :  { %v53_v6 = vpop.eup %52 }
  0xb1   :  { %v39_v7 = vadd.f32 1.0, %v53_v6 }
  0xb3   :  { %54 = vrcp.f32 %v39_v7 }
  0xbd   :  { %v55_v8 = vpop.eup %54 }
  0xbe   :  { %43 = vst.msk [vmem:[%s116_s2] sm:$0xff] %vm42_vm1, %v55_v8 }
  0xbf   :  { %48 = vsyncpa [#allocation3], 1 }

</bundles_post_ra>
